<compile_context>
chip_gen: v7x
topology: tpu7x:2x2x1
jax: 0.10.0
libtpu: 0.0.40
codegen_flags: <defaults>
</compile_context>

<pallas_src>
import jax
import jax.numpy as jnp
from jax.experimental import pallas as pl
from jax.experimental.pallas import tpu as pltpu


def mean_pooling_kernel(h_ref, m_ref, o_ref, msum_ref):
    # h_ref   : (tb, ts, th)  hidden states in their HBM dtype (e.g. bf16)
    # m_ref   : (tb, 1, ts)   attention mask, f32
    # o_ref   : (tb, 1, th)   f32 output block (resident across the s axis) = accumulator
    # msum_ref: (tb, 1, 1)    f32 scratch — mask-count accumulator
    s = pl.program_id(2)
    ns = pl.num_programs(2)

    @pl.when(s == 0)
    def _init():
        o_ref[...] = jnp.zeros_like(o_ref)
        msum_ref[...] = jnp.zeros_like(msum_ref)

    m = m_ref[...]                                    # (tb, 1, ts) f32
    h = h_ref[...]                                    # (tb, ts, th) storage dtype

    # Batched MXU contraction over the sequence axis with f32 accumulation.
    # Casting the mask to the hidden dtype is exact for 0/1 attention masks.
    o_ref[...] += jnp.einsum('bqs,bsh->bqh', m.astype(h.dtype), h,
                             preferred_element_type=jnp.float32)
    msum_ref[...] += jnp.sum(m, axis=2, keepdims=True)    # (tb, 1, 1), f32

    @pl.when(s == ns - 1)
    def _finalize():
        # clamp(min=1e-9) as in the PyTorch module, then one reciprocal on the
        # (tb, 1, 1) column and a broadcast multiply (no full-tile divide).
        inv = pl.reciprocal(jnp.maximum(msum_ref[...], 1e-9))
        o_ref[...] = o_ref[...] * inv


def _round_up(x, m):
    return (x + m - 1) // m * m


def _tile_candidates(dim):
    """Valid tile sizes for a lane-facing dim: the full dim, or divisors that
    are multiples of 128 (Mosaic's (8, 128) block constraint). Largest first."""
    cands = {dim}
    t = 128
    while t < dim:
        if dim % t == 0:
            cands.add(t)
        t += 128
    return sorted(cands, reverse=True)


def mean_pooling(last_hidden_state, attention_mask, *,
                 tb=None, ts=None, th=None,
                 tile_bytes_cap=16 * 1024 * 1024,
                 vmem_limit_bytes=48 * 1024 * 1024,
                 hidden_buffer_count=None):
    B, S, H = last_hidden_state.shape
    assert attention_mask.shape == (B, S)

    # Mask handled exactly like `.float()` in the PyTorch module; laid out as
    # (B, 1, S) so the sequence axis is the lane axis of its tiles (small,
    # dense VMEM footprint, directly consumable as the einsum LHS).
    mask3 = attention_mask.astype(jnp.float32).reshape(B, 1, S)

    itemsize = jnp.dtype(last_hidden_state.dtype).itemsize

    auto_tb, auto_th = tb is None, th is None
    if tb is None:
        tb = max(d for d in range(1, min(B, 8) + 1) if B % d == 0)

    # Prefer th == H (fully contiguous HBM reads, one lane-dense output slab,
    # mask DMA'd once); shrink the sequence tile first to respect the budget.
    hid_cands = [th] if th is not None else _tile_candidates(H)
    seq_cands = [ts] if ts is not None else _tile_candidates(S)
    chosen = None
    for th_c in hid_cands:
        for ts_c in seq_cands:
            if tb * ts_c * th_c * itemsize <= tile_bytes_cap:
                chosen = (ts_c, th_c)
                break
        if chosen is not None:
            break
    if chosen is None:                       # even the smallest tiles exceed the cap
        chosen = (seq_cands[-1], hid_cands[-1])
    ts, th = chosen

    # v7x has 2 TensorCores: make sure the "parallel" grid axes have >= 2 steps
    # whenever the shape allows it (only adjust auto-chosen tiles).
    if (B // tb) * (H // th) < 2:
        if auto_th and th % 256 == 0 and H % (th // 2) == 0:
            th //= 2
        elif auto_tb and tb > 1:
            tb = max(d for d in range(1, tb) if B % d == 0)

    # --- hardened validation (fail loudly instead of VMEM-OOM / bad layout) ---
    if B % tb or S % ts or H % th:
        raise ValueError(f"tiles must divide dims: B={B}%tb={tb}, S={S}%ts={ts}, H={H}%th={th}")
    if ts != S and ts % 128:
        raise ValueError(f"ts={ts} must equal S={S} or be a multiple of 128 (pad S instead)")
    if th != H and th % 128:
        raise ValueError(f"th={th} must equal H={H} or be a multiple of 128 (pad H instead)")

    nbuf = hidden_buffer_count if hidden_buffer_count is not None else 2
    hidden_tile = tb * _round_up(ts, 8) * _round_up(th, 128) * itemsize
    mask_tile = tb * 8 * _round_up(ts, 128) * 4
    out_tile = tb * 8 * _round_up(th, 128) * 4
    scratch = tb * 8 * 128 * 4
    est = nbuf * hidden_tile + 2 * mask_tile + 2 * out_tile + scratch
    if est > vmem_limit_bytes:
        raise ValueError(f"estimated VMEM footprint {est / 2**20:.1f} MiB exceeds the "
                         f"{vmem_limit_bytes / 2**20:.1f} MiB budget; lower tile_bytes_cap/tiles")

    grid = (B // tb, H // th, S // ts)       # reduction axis (s) last

    hidden_spec_kwargs = {}
    if hidden_buffer_count is not None:      # only if a trace shows exposed DMA
        hidden_spec_kwargs["pipeline_mode"] = pl.Buffered(hidden_buffer_count)

    out = pl.pallas_call(
        mean_pooling_kernel,
        out_shape=jax.ShapeDtypeStruct((B, 1, H), jnp.float32),
        grid_spec=pltpu.PrefetchScalarGridSpec(
            num_scalar_prefetch=0,
            grid=grid,
            in_specs=[
                pl.BlockSpec((tb, ts, th), lambda b, h, s: (b, s, h),
                             **hidden_spec_kwargs),
                pl.BlockSpec((tb, 1, ts), lambda b, h, s: (b, 0, s)),
            ],
            out_specs=pl.BlockSpec((tb, 1, th), lambda b, h, s: (b, 0, h)),
            scratch_shapes=[
                pltpu.VMEM((tb, 1, 1), jnp.float32),   # mask-count accumulator
            ],
        ),
        compiler_params=pltpu.CompilerParams(
            dimension_semantics=("parallel", "parallel", "arbitrary"),
            vmem_limit_bytes=vmem_limit_bytes,
        ),
    )(last_hidden_state, mask3)
    return out.reshape(B, H)


def mean_pooling_ref(last_hidden_state, attention_mask):
    h = last_hidden_state.astype(jnp.float32)
    m = attention_mask.astype(jnp.float32)[:, :, None]
    sum_emb = jnp.sum(h * m, axis=1)
    sum_mask = jnp.maximum(jnp.sum(m, axis=1), 1e-9)
    return sum_emb / sum_mask


if __name__ == "__main__":
    key = jax.random.PRNGKey(0)
    k_h, k_m, k_h2, k_m2 = jax.random.split(key, 4)

    # Toy shape implied by the module: batch=2, seq=8, hidden=32.
    # Hidden states kept in bf16 in HBM (typical encoder-output dtype); mask is 0/1.
    B, S, H = 2, 8, 32
    hidden = jax.random.normal(k_h, (B, S, H), dtype=jnp.float32).astype(jnp.bfloat16)
    attention_mask = (jax.random.uniform(k_m, (B, S)) > 0.3).astype(jnp.float32)

    out = jax.block_until_ready(mean_pooling(hidden, attention_mask))
    ref = mean_pooling_ref(hidden, attention_mask)
    assert out.shape == (B, H) and out.dtype == jnp.float32
    assert jnp.allclose(out, ref, atol=1e-5, rtol=1e-5), "mismatch vs reference (toy)"

    # Larger shape with explicit tiles: exercises the (b, h, s) grid, the
    # multi-step sequence accumulation into the resident output block, the
    # pl.when init/finalize path, and hidden-dim tiling.
    B2, S2, H2 = 4, 256, 256
    hidden2 = jax.random.normal(k_h2, (B2, S2, H2), dtype=jnp.float32).astype(jnp.bfloat16)
    mask2 = (jax.random.uniform(k_m2, (B2, S2)) > 0.3).astype(jnp.float32)
    out2 = jax.block_until_ready(mean_pooling(hidden2, mask2, tb=4, ts=128, th=128))
    ref2 = mean_pooling_ref(hidden2, mask2)
    assert jnp.allclose(out2, ref2, atol=1e-4, rtol=1e-4), "mismatch vs reference (tiled)"

    print("KERNEL_OK")
</pallas_src>

<mosaic_0001>
module attributes {stable_mosaic.version = 11 : i64} {
  func.func @mean_pooling_kernel(%arg0: i32, %arg1: i32, %arg2: i32, %arg3: memref<1x8x32xbf16, #tpu.memory_space<vmem>>, %arg4: memref<1x1x8xf32, #tpu.memory_space<vmem>>, %arg5: memref<1x1x32xf32, #tpu.memory_space<vmem>>, %arg6: memref<1x1x1xf32, #tpu.memory_space<vmem>>) attributes {dimension_semantics = [#tpu.dimension_semantics<parallel>, #tpu.dimension_semantics<parallel>, #tpu.dimension_semantics<arbitrary>], iteration_bounds = array<i64: 2, 1, 1>, scalar_prefetch = 0 : i64, scratch_operands = 1 : i64, tpu.core_type = #tpu.core_type<tc>, window_params = [{transform_indices = @transform_0, window_bounds = array<i64: 1, 8, 32>}, {transform_indices = @transform_1, window_bounds = array<i64: 1, 1, 8>}, {transform_indices = @transform_2, window_bounds = array<i64: 1, 1, 32>}]} {
    %c0_i32 = arith.constant 0 : i32
    %0 = arith.cmpi eq, %arg2, %c0_i32 : i32
    %1 = arith.extui %0 : i1 to i32
    %c0_i32_0 = arith.constant 0 : i32
    %2 = arith.cmpi ne, %1, %c0_i32_0 : i32
    scf.if %2 {
      %cst_21 = arith.constant 0.000000e+00 : f32
      %18 = vector.broadcast %cst_21 : f32 to vector<1x1x32xf32>
      %c0_22 = arith.constant 0 : index
      %c0_23 = arith.constant 0 : index
      %c0_24 = arith.constant 0 : index
      %19 = vector.load %arg5[%c0_22, %c0_23, %c0_24] : memref<1x1x32xf32, #tpu.memory_space<vmem>>, vector<1x1x32xf32>
      tpu.vector_store %arg5[%c0_22, %c0_23, %c0_24], %18 {strides = array<i32>} : memref<1x1x32xf32, #tpu.memory_space<vmem>>, vector<1x1x32xf32>,
      %cst_25 = arith.constant 0.000000e+00 : f32
      %20 = vector.broadcast %cst_25 : f32 to vector<1x1x1xf32>
      %c0_26 = arith.constant 0 : index
      %c0_27 = arith.constant 0 : index
      %c0_28 = arith.constant 0 : index
      %21 = vector.load %arg6[%c0_26, %c0_27, %c0_28] : memref<1x1x1xf32, #tpu.memory_space<vmem>>, vector<1x1x1xf32>
      tpu.vector_store %arg6[%c0_26, %c0_27, %c0_28], %20 {strides = array<i32>} : memref<1x1x1xf32, #tpu.memory_space<vmem>>, vector<1x1x1xf32>,
    } else {
    }
    %c0 = arith.constant 0 : index
    %c0_1 = arith.constant 0 : index
    %c0_2 = arith.constant 0 : index
    %3 = vector.load %arg4[%c0, %c0_1, %c0_2] : memref<1x1x8xf32, #tpu.memory_space<vmem>>, vector<1x1x8xf32>
    %c0_3 = arith.constant 0 : index
    %c0_4 = arith.constant 0 : index
    %c0_5 = arith.constant 0 : index
    %4 = vector.load %arg3[%c0_3, %c0_4, %c0_5] : memref<1x8x32xbf16, #tpu.memory_space<vmem>>, vector<1x8x32xbf16>
    %c0_6 = arith.constant 0 : index
    %c0_7 = arith.constant 0 : index
    %c0_8 = arith.constant 0 : index
    %5 = vector.load %arg5[%c0_6, %c0_7, %c0_8] : memref<1x1x32xf32, #tpu.memory_space<vmem>>, vector<1x1x32xf32>
    %6 = arith.truncf %3 : vector<1x1x8xf32> to vector<1x1x8xbf16>
    "tpu.trace_start"() <{level = 10 : i32, message = "bqs,bsh->bqh"}> : () -> ()
    %cst = arith.constant dense<0.000000e+00> : vector<1x1x32xf32>
    %7 = tpu.matmul %6, %4, %cst {dimension_numbers = #tpu.dot_dimension_numbers<[2], [1], [1], [2], [0, 0, 0, 1, 1, 2], [0], [0]>} : vector<1x1x8xbf16>, vector<1x8x32xbf16>, vector<1x1x32xf32> -> vector<1x1x32xf32>
    "tpu.trace_stop"() : () -> ()
    %8 = arith.addf %5, %7 : vector<1x1x32xf32>
    %c0_9 = arith.constant 0 : index
    %c0_10 = arith.constant 0 : index
    %c0_11 = arith.constant 0 : index
    %9 = vector.load %arg5[%c0_9, %c0_10, %c0_11] : memref<1x1x32xf32, #tpu.memory_space<vmem>>, vector<1x1x32xf32>
    tpu.vector_store %arg5[%c0_9, %c0_10, %c0_11], %8 {strides = array<i32>} : memref<1x1x32xf32, #tpu.memory_space<vmem>>, vector<1x1x32xf32>,
    %c0_12 = arith.constant 0 : index
    %c0_13 = arith.constant 0 : index
    %c0_14 = arith.constant 0 : index
    %10 = vector.load %arg6[%c0_12, %c0_13, %c0_14] : memref<1x1x1xf32, #tpu.memory_space<vmem>>, vector<1x1x1xf32>
    %cst_15 = arith.constant dense<0.000000e+00> : vector<1x1xf32>
    %11 = vector.multi_reduction <add>, %3, %cst_15 [2] : vector<1x1x8xf32> to vector<1x1xf32>
    %12 = vector.shape_cast %11 : vector<1x1xf32> to vector<1x1x1xf32>
    %13 = arith.addf %10, %12 : vector<1x1x1xf32>
    %c0_16 = arith.constant 0 : index
    %c0_17 = arith.constant 0 : index
    %c0_18 = arith.constant 0 : index
    %14 = vector.load %arg6[%c0_16, %c0_17, %c0_18] : memref<1x1x1xf32, #tpu.memory_space<vmem>>, vector<1x1x1xf32>
    tpu.vector_store %arg6[%c0_16, %c0_17, %c0_18], %13 {strides = array<i32>} : memref<1x1x1xf32, #tpu.memory_space<vmem>>, vector<1x1x1xf32>,
    %c0_i32_19 = arith.constant 0 : i32
    %15 = arith.cmpi eq, %arg2, %c0_i32_19 : i32
    %16 = arith.extui %15 : i1 to i32
    %c0_i32_20 = arith.constant 0 : i32
    %17 = arith.cmpi ne, %16, %c0_i32_20 : i32
    scf.if %17 {
      %c0_21 = arith.constant 0 : index
      %c0_22 = arith.constant 0 : index
      %c0_23 = arith.constant 0 : index
      %18 = vector.load %arg6[%c0_21, %c0_22, %c0_23] : memref<1x1x1xf32, #tpu.memory_space<vmem>>, vector<1x1x1xf32>
      %cst_24 = arith.constant 9.99999971E-10 : f32
      %19 = vector.broadcast %cst_24 : f32 to vector<1x1x1xf32>
      %20 = arith.maximumf %18, %19 : vector<1x1x1xf32>
      %21 = tpu.reciprocal %20 : vector<1x1x1xf32> -> vector<1x1x1xf32>
      %c0_25 = arith.constant 0 : index
      %c0_26 = arith.constant 0 : index
      %c0_27 = arith.constant 0 : index
      %22 = vector.load %arg5[%c0_25, %c0_26, %c0_27] : memref<1x1x32xf32, #tpu.memory_space<vmem>>, vector<1x1x32xf32>
      %23 = vector.broadcast %21 : vector<1x1x1xf32> to vector<1x1x32xf32>
      %24 = arith.mulf %22, %23 : vector<1x1x32xf32>
      %c0_28 = arith.constant 0 : index
      %c0_29 = arith.constant 0 : index
      %c0_30 = arith.constant 0 : index
      %25 = vector.load %arg5[%c0_28, %c0_29, %c0_30] : memref<1x1x32xf32, #tpu.memory_space<vmem>>, vector<1x1x32xf32>
      tpu.vector_store %arg5[%c0_28, %c0_29, %c0_30], %24 {strides = array<i32>} : memref<1x1x32xf32, #tpu.memory_space<vmem>>, vector<1x1x32xf32>,
    } else {
    }
    return
  }
  func.func @transform_0(%arg0: i32, %arg1: i32, %arg2: i32) -> (i32, i32, i32) {
    %c0_i32 = arith.constant 0 : i32
    return %arg0, %arg2, %arg1 : i32, i32, i32
  }
  func.func @transform_1(%arg0: i32, %arg1: i32, %arg2: i32) -> (i32, i32, i32) {
    %c0_i32 = arith.constant 0 : i32
    %c0_i32_0 = arith.constant 0 : i32
    return %arg0, %c0_i32, %arg2 : i32, i32, i32
  }
  func.func @transform_2(%arg0: i32, %arg1: i32, %arg2: i32) -> (i32, i32, i32) {
    %c0_i32 = arith.constant 0 : i32
    %c0_i32_0 = arith.constant 0 : i32
    return %arg0, %c0_i32, %arg1 : i32, i32, i32
  }
}

</mosaic_0001>

<bundles_post_ra>
// kernel: tpu_custom_call.1
= control target key start
LH: loop header
LB: loop body
LE: loop exit
PB: predicated region body
PF: predicated region fallthrough
CT: control target
= control target key end

     0   :  { %7 = vsyncpa [#allocation4], 0  ;;  %s819_s0 = inlined_call_operand.hbm [shape: bf16[2,8,32], index: 0, kind: input, shape index: {}]   ;;  %s820_s1 = inlined_call_operand.vmem [shape: f32[2,1,8], index: 1, kind: input, shape index: {}]   ;;  %s821_s2 = inlined_call_operand.hbm [shape: f32[2,1,32], index: 2, kind: output, shape index: {}]  }
   0x1   :  { %9 = vsyncpa [#allocation4 + $0x1], 0 }
   0x2   :  { %10 = vsyncpa [#allocation5], 0 }
   0x3   :  { %12 = vsyncpa [#allocation5 + $0x1], 0  ;;  %s628_s9 = smov 0   ;;  %s630_s10 = smov 0  }
   0x4   :  { %s632_s11 = smov 0   ;;  %s634_s12 = smov 0  }
   0x5   :  { %s636_s13 = smov 0   ;;  %s638_s14 = smov 0  }
   0x6 LB: > { %s406_s15 = sadd.s32 4294967295, %s606_s14   ;;  %s407_s16 = sadd.s32 4294967294, %s606_s14   ;;  %s606_s14 = sphi %s638_s14, %s18_s14   ;;  %s602_s13 = sphi %s636_s13, %s837_s13   ;;  %s598_s12 = sphi %s634_s12, %s836_s12   ;;  %s594_s11 = sphi %s632_s11, %s835_s11   ;;  %s590_s10 = sphi %s630_s10, %s834_s10   ;;  %s586_s9 = sphi %s628_s9, %s833_s9  }
   0x7   : > { %s37_s17 = sadd.s32 1, %s602_s13  ;;  %s48_s18 = sadd.s32 1, %s594_s11 }
   0x8   : > { %p39_p0 = scmp.ge.s32.totalorder %s37_s17, 2  ;;  %p55_p1 = scmp.ne.s32.totalorder %s594_s11, %s590_s10 }
   0x9   : > { %p56_p2 = scmp.eq.s32.totalorder %s606_s14, 0  ;;  %p61_p3 = scmp.ne.s32.totalorder %s590_s10, %s586_s9 }
   0xa   : > { %s839_s17 = smov (%p39_p0, %s37_s17), 0  ;;  %p62_p5 = scmp.eq.s32.totalorder %s406_s15, 0 }
   0xb   : > { %p669_p4 = por %p56_p2, %p55_p1  ;;  %s41_s20 = ssub.s32 %s602_s13, %s839_s17 }
   0xc   : > { %p115_p6 = scmp.eq.s32.totalorder %s406_s15, 1  ;;  %p46_p7 = scmp.eq.s32.totalorder %s41_s20, 0 }
   0xd   : > { %p675_p8 = por %p62_p5, %p61_p3  ;;  %p121_p10 = scmp.eq.s32.totalorder %s407_s16, 1 }
   0xe   : > { %p679_p9 = por %p115_p6, %p55_p1  ;;  %p438_p13 = scmp.lt.s32.totalorder %s606_s14, 2 }
   0xf   : > { %s684_s23 = scalar_select %p46_p7, %s594_s11, %s48_s18  }
  0x10   : > { %s825_s22 = scalar_select %p679_p9, 1, 0 }
  0x11   : > { %p686_p11 = por %p121_p10, %p61_p3  ;;  %s141_s25 = sand.u32 1, %s594_s11  }
  0x12   : > { %s410_s26 = sshll.u32 %s141_s25, 2  ;;  %s411_s27 = sshll.u32 %s602_s13, 6 }
  0x13   : > { %s826_s24 = scalar_select %p686_p11, 1, 0 }
  0x14   : > { %s697_s30 = scalar_lea.hbm %s819_s0, %s411_s27  ;;  %s145_s3 = scalar_lea.vmem [#allocation3], %s410_s26 }
  0x15   : > { %s154_s4 = sshll.u32 %s145_s3, 4  ;;  %p703_p0 = pnand %p438_p13, %p669_p4  ;;  %s699_s4 = int_to_ptr.vmem [resolvable:$true] %s154_s4 }
  0x16   : > { %s142_s6 = scalar_lea.sflag [#allocation4], %s141_s25  ;;  %s494_s7 = scalar_lea.hbm %s697_s30, 64 }
  0x17   : > { %p495_p3 = scmp.ne.s32.totalorder %s697_s30, %s494_s7  ;;  %p496_p5 = pneg %p703_p0 }
  0x18   : > { %s499_s16 = scalar_lea.hbm %s819_s0, 128  ;;  %p500_p4 = scmp.lt.u32.totalorder %s697_s30, %s819_s0 }
  0x19   : > { %p497_p6 = pnand %p496_p5, %p495_p3  ;;  %p501_p10 = scmp.lt.u32.totalorder %s499_s16, %s494_s7 }
  0x1a   : > { %p503_p12 = scmp.lt.u32.totalorder %s494_s7, %s697_s30 }
  0x1b   : > { %p498_p7 = pneg %p497_p6  ;;  %p502_p13 = por %p501_p10, %p500_p4 }
  0x1d   : > { %p504_p1 = por %p503_p12, %p502_p13 }
  0x1f   : > { %p505_p2 = pnand %p504_p1, %p498_p7 }
  0x21   : > { %508 = shalt.err (!%p505_p2)
}
  0x22   : > { %s509_s20 = scalar_lea.vmem %s699_s4, 64  ;;  %s608_s25 = smov [#allocation3]  }
  0x23   : > { %p510_p3 = scmp.ne.s32.totalorder %s699_s4, %s509_s20  ;;  %s514_s26 = sshll.u32 %s608_s25, 4  ;;  %s515_s26 = int_to_ptr.vmem [resolvable:$false] %s514_s26 }
  0x24   : > { %s516_s27 = scalar_lea.vmem %s515_s26, 128  ;;  %p517_p9 = scmp.lt.s32.totalorder %s699_s4, %s515_s26 }
  0x25   : > { %p512_p6 = pnand %p510_p3, %p496_p5  ;;  %p518_p4 = scmp.lt.s32.totalorder %s516_s27, %s509_s20 }
  0x27   : > { %p513_p11 = pneg %p512_p6  ;;  %p519_p10 = por %p518_p4, %p517_p9 }
  0x29   : > { %p520_p12 = pnand %p519_p10, %p513_p11 }
  0x2b   : > { %523 = shalt.err (!%p520_p12)
}
  0x2c   : > { %433 = dma.hbm_to_vmem [thread:$0]  (!%p703_p0), %s697_s30, 64, %s699_s4, %s142_s6  }
  0x2d   : > { %p828_p1 = scmp.lt.s32.totalorder %s606_s14, 3  ;;  %p829_p2 = scmp.ge.s32.totalorder %s606_s14, 1 }
  0x2f   : > { %p169_p5 = pnand %p829_p2, %p828_p1 }
  0x30   : > { %s739_s28 = sand.u32 (!%p169_p5), 1, %s590_s10  }
  0x31   : > { %172 = sbr.rel (%p169_p5) target bundleno = 375 (0x177), region = 28  ;;  %s413_s29 = sshll.u32 (!%p169_p5), %s739_s28, 2 }
  0x32   : > { %s175_s3 = scalar_lea.sflag (!%p169_p5), [#allocation4], %s739_s28  ;;  %s178_s7 = scalar_lea.vmem (!%p169_p5), [#allocation3], %s413_s29 }
  0x38   : > { %577 = dma.done.wait (%p675_p8), %s175_s3, 64  }
  0x39   : > { %579 = vsyncadd (%p675_p8), %s175_s3, 4294967232  ;;  %p204_p9 = scmp.lt.s32.totalorder %s598_s12, 1  ;;  %vm215_vm0 = vcmask 253952   ;;  %s749_s30 = scalar_lea.vmem [#allocation6], %s739_s28  ;;  %v609_v0 = vmov 0.0   ;;  %vm217_vm1 = vcmask 0   ;;  %v294_v19 = vlaneseq }
  0x3a   : > { %216 = vst.msk [vmem:[%s749_s30] sm:$0x1] %vm215_vm0, %v609_v0  ;;  %420 = vmatprep.subr.bf16.mxu0 %v609_v0  ;;  %vm610_vm2 = vmmov 0   ;;  %vm275_vm3 = vcmask 57344   ;;  %vm227_vm4 = vcmask 1043456   ;;  %vm223_vm5 = vcmask 64512  }
  0x3b   : > { %s205_s4 = scalar_select %p204_p9, %s598_s12, 1  ;;  %218 = vst.msk [vmem:[#allocation2] sm:$0x1] %vm217_vm1, %v609_v0  ;;  %422 = vmatprep.mubr.msk.bf16.mxu0 %vm610_vm2, %v609_v0  ;;  %v220_v2 = vld [vmem:[%s178_s7] sm:$0xf]  ;;  %v611_v6 = vmov 0  }
  0x3c   : > { %v229_v5 = vsel %vm227_vm4, %v220_v2, 0  ;;  %491 = vset.pattern.permute.xlu0 %v611_v6  ;;  %v295_v20 = vshrl.u32 %v294_v19, 7  ;;  %s415_s8 = sshll.u32 %s598_s12, 4  ;;  %s314_s15 = sshll.u32 %s749_s30, 4  ;;  %s770_s15 = int_to_ptr.vmem [resolvable:$true] %s314_s15 }
  0x3d   : > { %s209_s6 = scalar_lea.vmem %s820_s1, %s205_s4  ;;  %421 = vmatpush3.bf16.msra.mxu0 %v229_v5  ;;  %s768_s19 = scalar_lea.hbm %s821_s2, %s415_s8 }
  0x3e   : > { %v219_v1 = vld [vmem:[%s209_s6] sm:$0x1]  ;;  %v296_v21 = vsub.s32 0, %v295_v20  ;;  %s301_s20 = scalar_lea.sflag [#allocation5], %s739_s28  ;;  %s524_s25 = scalar_lea.vmem %s770_s15, 16 }
  0x3f   : > { %v276_v3 = vsel %vm275_vm3, %v219_v1, 0.0  ;;  %v222_v4 = vpack.c.bf16 %v219_v1, %v219_v1  ;;  %p525_p8 = scmp.ne.s32.totalorder %s770_s15, %s524_s25  ;;  %p830_p11 = scmp.ne.s32.totalorder %s825_s22, 0 }
  0x40   : > { %277 = vadd.xlane.f32.xlu0 %v276_v3  ;;  %s612_s12 = smov [#allocation6]  }
  0x41   : > { %423 = vmatmul.mubr.msk.bf16.vlgmr.msra.gmra.mrb[0].mxu0 %vm223_vm5, %v222_v4  ;;  %v221_v13 = vld [vmem:[%s749_s30] sm:$0x1]  ;;  %p526_p0 = pnand %p525_p8, %p830_p11  ;;  %s528_s26 = sshll.u32 %s612_s12, 4  ;;  %s529_s26 = int_to_ptr.vmem [resolvable:$false] %s528_s26 }
  0x42   : > { %v274_v7 = vld [vmem:[#allocation2] sm:$0x1]  ;;  %s530_s27 = scalar_lea.vmem %s529_s26, 32  ;;  %p531_p13 = scmp.lt.s32.totalorder %s770_s15, %s529_s26 }
  0x43   : > { %p527_p7 = pneg %p526_p0  ;;  %p532_p3 = scmp.lt.s32.totalorder %s530_s27, %s524_s25 }
  0x45   : > { %p533_p6 = por %p532_p3, %p531_p13 }
  0x47   : > { %p534_p4 = pnand %p533_p6, %p527_p7 }
  0xcd   : > { %v278_v8 = vpop.xlane.xlu0 %277 }
  0xce   : > { %v279_v9 = vadd.f32 %v278_v8, %v274_v7 }
  0xd0   : > { %281 = vst.msk [vmem:[#allocation2] sm:$0x1] %vm217_vm1, %v279_v9 }
  0xd7   : > { %v285_v10 = vld [vmem:[#allocation2] sm:$0x1] }
  0xd8   : > { %v286_v11 = vmax.f32 %v285_v10, 1e-09 }
  0xda   : > { %492 = vrcp.f32 %v286_v11 }
  0xe4   : > { %v493_v12 = vpop.eup %492 }
  0xe5   : > { %291 = vperm.xlu0 %491, %v493_v12  }
 0x114   : > { %v265_v14 = vpop.f32.mrb[0].mxu0 }
 0x115   : > { %v271_v15 = vadd.f32 %v265_v14, %v221_v13  ;;  %v424_v16 = vpop.f32.mrb[1].mxu0 }
 0x116   : > { %v268_v17 = vpop.f32.mrb[2].mxu0 }
 0x117   : > { %273 = vst.msk [vmem:[%s749_s30] sm:$0x1] %vm215_vm0, %v271_v15  ;;  %v425_v18 = vpop.f32.mrb[3].mxu0 }
 0x11e   : > { %v288_v23 = vld [vmem:[%s749_s30] sm:$0x1] }
 0x164   : > { %v292_v22 = vpop.permute.xlu0 %291 }
 0x165   : > { %v297_v24 = vrot.slane %v292_v22, %v296_v21 }
 0x167   : > { %v298_v25 = vmul.f32 %v297_v24, %v288_v23 }
 0x169   : > { %299 = vst.msk [vmem:[%s749_s30] sm:$0x1] %vm215_vm0, %v298_v25 }
 0x16a   : > { %537 = shalt.err (!%p534_p4)
}
 0x16b   : > { %s538_s28 = scalar_lea.hbm %s768_s19, 16  ;;  %s542_s7 = scalar_lea.hbm %s821_s2, 32 }
 0x16c   : > { %p539_p10 = scmp.ne.s32.totalorder %s768_s19, %s538_s28  ;;  %p543_p2 = scmp.lt.u32.totalorder %s768_s19, %s821_s2 }
 0x16d   : > { %p544_p5 = scmp.lt.u32.totalorder %s542_s7, %s538_s28  ;;  %p546_p8 = scmp.lt.u32.totalorder %s538_s28, %s768_s19 }
 0x16e   : > { %p540_p12 = pnand %p539_p10, %p830_p11 }
 0x16f   : > { %p545_p9 = por %p544_p5, %p543_p2 }
 0x170   : > { %p541_p1 = pneg %p540_p12 }
 0x171   : > { %p547_p0 = por %p546_p8, %p545_p9 }
 0x173   : > { %p548_p7 = pnand %p547_p0, %p541_p1 }
 0x175   : > { %551 = shalt.err (!%p548_p7)
}
 0x176   : > { %428 = dma.vmem_to_hbm [thread:$0]  (%p830_p11), %s770_s15, 16, %s768_s19, %s301_s20  }
 0x177 PF: > { %s326_s21 = sand.u32 1, %s586_s9   ;;  %p831_p13 = scmp.ne.s32.totalorder %s826_s24, 0 }
 0x178   : > { %p832_p3 = scmp.ge.s32.totalorder %s606_s14, 2  ;;  %s327_s5 = scalar_lea.sflag [#allocation5], %s326_s21 }
 0x17a   : > { %p435_p6 = pnand %p832_p3, %p831_p13 }
 0x17c   : > { %581 = dma.done.wait (!%p435_p6), %s327_s5, 16  }
 0x17d   : > { %583 = vsyncadd (!%p435_p6), %s327_s5, 4294967280  ;;  %s18_s14 = sadd.s32 1, %s606_s14   ;;  %s833_s9 = smov %s590_s10 }
 0x17e   : > { %p15_p4 = scmp.ge.s32.totalorder %s18_s14, 4   ;;  %s834_s10 = smov %s594_s11 }
 0x17f   : > { %s835_s11 = smov %s684_s23  ;;  %s836_s12 = smov %s602_s13 }
 0x180   : > { %s837_s13 = smov %s839_s17  ;;  %17 = sbr.rel (!%p15_p4) target bundleno = 6 (0x6), region = 84 }
 0x187   :  { %331 = vsyncpa [#allocation4], 1 }
 0x188   :  { %333 = vsyncpa [#allocation4 + $0x1], 1 }
 0x189   :  { %334 = vsyncpa [#allocation5], 1 }
 0x18a   :  { %336 = vsyncpa [#allocation5 + $0x1], 1 }

</bundles_post_ra>
